<compile_context>
chip_gen: v5e
topology: v5e:2x2
jax: 0.10.0
libtpu: 0.0.40
codegen_flags: <defaults>
</compile_context>

<pallas_src>
import functools

import jax
import jax.numpy as jnp
from jax.experimental import pallas as pl
from jax.experimental.pallas import tpu as pltpu


_TARGET_TILE_BYTES = 4 * 1024 * 1024  # ~4 MiB input tile; 2x(in)+2x(out) double-buffered
                                      # stays well inside every generation's VMEM.


def _norm_kernel(g_ref, o_ref):
    # g_ref / o_ref: (TB, TR, N) VMEM tile. The column (reduction) axis is never
    # tiled, so the row-sum is complete inside the block.
    g = g_ref[...]
    degree = jnp.sum(g.astype(jnp.float32), axis=-1, keepdims=True)   # (TB, TR, 1)
    # remove_nan_inf(1/degree): guard the zero-degree rows instead of dividing
    # and patching NaN/Inf afterwards.
    inv = jnp.where(degree != 0.0, 1.0 / degree, 0.0)
    # Keep the big tensor in its native dtype (bf16 stays bf16 on v6e/v7x).
    o_ref[...] = (g * inv.astype(g.dtype)).astype(o_ref.dtype)


def _choose_tiles(B, N, itemsize):
    """Pick (TB, TR): graphs-per-block and rows-per-block (~_TARGET_TILE_BYTES)."""
    graph_bytes = N * N * itemsize
    if graph_bytes >= _TARGET_TILE_BYTES:
        # Large graphs: one graph per block, tile the row axis (multiple of 8).
        TB = 1
        if N % 8 == 0:
            TR = max(8, (_TARGET_TILE_BYTES // (N * itemsize)) // 8 * 8)
            TR = min(TR, N)
        else:
            TR = N  # block dim == array dim is always a legal block shape
    else:
        # Small graphs: pack many graphs per block to amortize per-step overhead.
        TR = N
        TB = int(max(1, min(B, _TARGET_TILE_BYTES // max(graph_bytes, 1))))
    return TB, TR


@jax.jit
def _norm_batched(graph):
    """Normalize one batched adjacency tensor of shape (B, N, N)."""
    B, N, _ = graph.shape
    itemsize = jnp.dtype(graph.dtype).itemsize
    TB, TR = _choose_tiles(B, N, itemsize)
    grid = (pl.cdiv(B, TB), pl.cdiv(N, TR))

    in_spec = pl.BlockSpec((TB, TR, N), lambda b, r: (b, r, 0))
    out_spec = pl.BlockSpec((TB, TR, N), lambda b, r: (b, r, 0))

    # TODO(synk): for N < 128 the last dim is lane-sparse (N of 128 lanes); a
    # lane-dense (B, N*N) presentation would need an in-kernel reshape /
    # segmented lane reduction and is not attempted here.
    return pl.pallas_call(
        _norm_kernel,
        out_shape=jax.ShapeDtypeStruct((B, N, N), graph.dtype),
        grid_spec=pltpu.PrefetchScalarGridSpec(
            num_scalar_prefetch=0,
            grid=grid,
            in_specs=[in_spec],
            out_specs=out_spec,
        ),
        compiler_params=pltpu.CompilerParams(
            dimension_semantics=("parallel", "parallel"),
            vmem_limit_bytes=48 << 20,   # above default scoped limit, below v7x physical
        ),
        cost_estimate=pl.CostEstimate(
            flops=2 * B * N * N,
            transcendentals=B * N,
            bytes_accessed=2 * B * N * N * itemsize,
        ),
    )(graph)


def normalizer_forward(adj):
    """Pallas equivalent of Normalizer.forward: list of graphs -> list of normed graphs.

    Same-shape graphs are stacked into a single (G*B, N, N) array so the whole
    list is handled by one fused pallas_call (one dispatch, longer parallel grid).
    """
    if not adj:
        return []
    groups = {}
    order = []
    for i, g in enumerate(adj):
        key = (tuple(g.shape), jnp.dtype(g.dtype))
        if key not in groups:
            groups[key] = []
            order.append(key)
        groups[key].append(i)

    out = [None] * len(adj)
    for key in order:
        idxs = groups[key]
        (B, N, _), _dt = key
        stacked = jnp.concatenate([adj[i] for i in idxs], axis=0)  # (G*B, N, N)
        normed = _norm_batched(stacked)
        for k, i in enumerate(idxs):
            out[i] = normed[k * B:(k + 1) * B]
    return out


def _reference_norm(graph: jax.Array) -> jax.Array:
    """Pure-JAX reference mirroring the PyTorch code."""
    degree = jnp.sum(graph, axis=2)
    inv = 1.0 / degree
    inv = jnp.where(jnp.isfinite(inv), inv, 0.0)
    deg_diag = jax.vmap(jnp.diag)(inv)                   # diag_embed
    return jnp.einsum("bij,bjk->bik", deg_diag, graph)   # bmm


if __name__ == "__main__":
    key = jax.random.PRNGKey(0)
    k0, k1 = jax.random.split(key)

    B, N = 2, 16
    # Two graphs in the adjacency list; zero out some rows to exercise the
    # nan/inf removal path (degree == 0 -> inv -> 0).
    g0 = jax.random.uniform(k0, (B, N, N), dtype=jnp.float32)
    g0 = g0.at[:, 0, :].set(0.0)
    g1 = jax.random.uniform(k1, (B, N, N), dtype=jnp.float32)
    g1 = g1.at[:, -1, :].set(0.0)
    adj = [g0, g1]

    outs = normalizer_forward(adj)
    outs = [jax.block_until_ready(o) for o in outs]

    for g, o in zip(adj, outs):
        ref = _reference_norm(g)
        assert o.shape == ref.shape and o.dtype == ref.dtype
        assert jnp.allclose(o, ref, atol=1e-5, rtol=1e-5), "mismatch vs reference"

    print("KERNEL_OK")
</pallas_src>

<mosaic_0001>
module attributes {stable_mosaic.version = 11 : i64} {
  func.func @_norm_kernel(%arg0: i32, %arg1: i32, %arg2: memref<4x16x16xf32, #tpu.memory_space<vmem>>, %arg3: memref<4x16x16xf32, #tpu.memory_space<vmem>>) attributes {dimension_semantics = [#tpu.dimension_semantics<parallel>, #tpu.dimension_semantics<parallel>], iteration_bounds = array<i64: 1, 1>, scalar_prefetch = 0 : i64, scratch_operands = 0 : i64, tpu.core_type = #tpu.core_type<tc>, window_params = [{transform_indices = @transform_0, window_bounds = array<i64: 4, 16, 16>}, {transform_indices = @transform_1, window_bounds = array<i64: 4, 16, 16>}]} {
    %c0 = arith.constant 0 : index
    %c0_0 = arith.constant 0 : index
    %c0_1 = arith.constant 0 : index
    %0 = vector.load %arg2[%c0, %c0_0, %c0_1] : memref<4x16x16xf32, #tpu.memory_space<vmem>>, vector<4x16x16xf32>
    %cst = arith.constant dense<0.000000e+00> : vector<4x16xf32>
    %1 = vector.multi_reduction <add>, %0, %cst [2] : vector<4x16x16xf32> to vector<4x16xf32>
    %2 = vector.shape_cast %1 : vector<4x16xf32> to vector<4x16x1xf32>
    %cst_2 = arith.constant 0.000000e+00 : f32
    %3 = vector.broadcast %cst_2 : f32 to vector<4x16x1xf32>
    %4 = arith.cmpf one, %2, %3 : vector<4x16x1xf32>
    %cst_3 = arith.constant 1.000000e+00 : f32
    %5 = vector.broadcast %cst_3 : f32 to vector<4x16x1xf32>
    %6 = arith.divf %5, %2 : vector<4x16x1xf32>
    %cst_4 = arith.constant 0.000000e+00 : f32
    %7 = vector.broadcast %cst_4 : f32 to vector<4x16x1xf32>
    %8 = arith.select %4, %6, %7 : vector<4x16x1xi1>, vector<4x16x1xf32>
    %9 = vector.broadcast %8 : vector<4x16x1xf32> to vector<4x16x16xf32>
    %10 = arith.mulf %0, %9 : vector<4x16x16xf32>
    %c0_5 = arith.constant 0 : index
    %c0_6 = arith.constant 0 : index
    %c0_7 = arith.constant 0 : index
    %11 = vector.load %arg3[%c0_5, %c0_6, %c0_7] : memref<4x16x16xf32, #tpu.memory_space<vmem>>, vector<4x16x16xf32>
    tpu.vector_store %arg3[%c0_5, %c0_6, %c0_7], %10 {strides = array<i32>} : memref<4x16x16xf32, #tpu.memory_space<vmem>>, vector<4x16x16xf32>,
    return
  }
  func.func @transform_0(%arg0: i32, %arg1: i32) -> (i32, i32, i32) {
    %c0_i32 = arith.constant 0 : i32
    %c0_i32_0 = arith.constant 0 : i32
    return %arg0, %arg1, %c0_i32 : i32, i32, i32
  }
  func.func @transform_1(%arg0: i32, %arg1: i32) -> (i32, i32, i32) {
    %c0_i32 = arith.constant 0 : i32
    %c0_i32_0 = arith.constant 0 : i32
    return %arg0, %arg1, %c0_i32 : i32, i32, i32
  }
}

</mosaic_0001>

<bundles_post_ra>
// kernel: _norm_batched.1
= control target key start
LH: loop header
LB: loop body
LE: loop exit
PB: predicated region body
PF: predicated region fallthrough
CT: control target
= control target key end

     0   :  { %6 = vsyncpa [#allocation3], 0  ;;  %s470_s0 = inlined_call_operand.hbm [shape: f32[4,16,16], index: 0, kind: input, shape index: {}]   ;;  %s471_s1 = inlined_call_operand.hbm [shape: f32[4,16,16], index: 1, kind: output, shape index: {}]  }
   0x1   :  { %7 = vsyncpa [#allocation4], 0  ;;  %s12_s8 = sshll.u32 %s470_s0, 4  ;;  %s301_s9 = smov [#allocation2]   ;;  %s13_s8 = int_to_ptr.hbm [resolvable:$true] %s12_s8 }
   0x2   :  { %s14_s10 = sshll.u32 %s301_s9, 4  ;;  %s302_s11 = smov 128   ;;  %s15_s10 = int_to_ptr.vmem [resolvable:$true] %s14_s10 }
   0x3   :  { %s303_s12 = smov 8  }
   0x4   :  { %20 = dma.hbm_to_vmem [thread:$0]  %s13_s8, 1024, %s15_s10, [#allocation3], %s302_s11, %s302_s11, %s303_s12  }
   0x5   :  { %297 = dma.done.wait [#allocation3], 1024  }
   0x6   :  { %298 = vsyncadd [#allocation3], 4294966272  ;;  %vm33_vm0 = vcmask 130048   ;;  %v321_v0 = vld [vmem:[#allocation2 + $0x20] sm:$0xff]  ;;  %v323_v1 = vld [vmem:[#allocation2 + $0x10] sm:$0xff]  ;;  %s304_s0 = smov [#allocation5]  }
   0x7   :  { %v325_v2 = vld [vmem:[#allocation2] sm:$0xff]  ;;  %v46_v3 = vsel %vm33_vm0, %v321_v0, 0.0  ;;  %v40_v4 = vsel %vm33_vm0, %v323_v1, 0.0  ;;  %v333_v6 = vld [vmem:[#allocation2 + $0x28] sm:$0xff]  ;;  %v335_v7 = vld [vmem:[#allocation2 + $0x18] sm:$0xff]  ;;  %s214_s13 = sshll.u32 %s304_s0, 4  ;;  %s215_s13 = int_to_ptr.vmem [resolvable:$true] %s214_s13 }
   0x8   :  { %v34_v5 = vsel %vm33_vm0, %v325_v2, 0.0  ;;  %47 = vadd.xlane.f32.xlu2 %v46_v3  ;;  %41 = vadd.xlane.f32.xlu1 %v40_v4  ;;  %v337_v8 = vld [vmem:[#allocation2 + $0x8] sm:$0xff]  ;;  %v49_v9 = vsel %vm33_vm0, %v333_v6, 0.0  ;;  %v43_v10 = vsel %vm33_vm0, %v335_v7, 0.0  ;;  %v345_v12 = vld [vmem:[#allocation2 + $0x38] sm:$0xff]  ;;  %v347_v13 = vld [vmem:[#allocation2 + $0x30] sm:$0xff] }
   0x9   :  { %35 = vadd.xlane.f32.xlu0 %v34_v5  ;;  %v37_v11 = vsel %vm33_vm0, %v337_v8, 0.0  ;;  %v55_v14 = vsel %vm33_vm0, %v345_v12, 0.0  ;;  %v52_v15 = vsel %vm33_vm0, %v347_v13, 0.0  ;;  %s216_s16 = sshll.u32 %s471_s1, 4  ;;  %s217_s16 = int_to_ptr.hbm [resolvable:$true] %s216_s16 }
  0x10   :  { %50 = vadd.xlane.f32.xlu2 %v49_v9  ;;  %44 = vadd.xlane.f32.xlu1 %v43_v10 }
  0x11   :  { %38 = vadd.xlane.f32.xlu0 %v37_v11 }
  0x18   :  { %56 = vadd.xlane.f32.xlu1 %v55_v14 }
  0x19   :  { %53 = vadd.xlane.f32.xlu0 %v52_v15 }
  0x7b   :  { %v48_v16 = vpop.xlane.xlu2 %47  ;;  %v353_v17 = vpop.xlane.xlu1 %41 }
  0x7c   :  { %233 = vrcp.f32 %v48_v16  ;;  %v355_v18 = vpop.xlane.xlu0 %35  ;;  %v135_v19 = vand.u32 2147483647, %v48_v16  ;;  %v137_v20 = vand.u32 2147483648, %v48_v16  ;;  %vm131_vm1 = vweird.f32 %v48_v16 }
  0x7d   :  { %235 = vrcp.f32 %v353_v17  ;;  %vm62_vm2 = vcmp.ne.f32.partialorder %v48_v16, 0.0  ;;  %vm101_vm3 = vweird.f32 %v353_v17  ;;  %v105_v26 = vand.u32 2147483647, %v353_v17 }
  0x7e   :  { %237 = vrcp.f32 %v355_v18  ;;  %vm367_vm4 = vcmp.eq.f32.partialorder %v135_v19, 8.507059e+37  ;;  %v138_v31 = vor.u32 1.1754944e-38, %v137_v20  ;;  %vm60_vm5 = vcmp.ne.f32.partialorder %v353_v17, 0.0 }
  0x7f   :  { %v107_v32 = vand.u32 2147483648, %v353_v17  ;;  %vm71_vm6 = vweird.f32 %v355_v18  ;;  %v75_v35 = vand.u32 2147483647, %v355_v18  ;;  %vm58_vm8 = vcmp.ne.f32.partialorder %v355_v18, 0.0 }
  0x80   :  { %v77_v38 = vand.u32 2147483648, %v355_v18  ;;  %vm381_vm10 = vcmp.eq.f32.partialorder %v105_v26, 8.507059e+37 }
  0x81   :  { %v108_v43 = vor.u32 1.1754944e-38, %v107_v32  ;;  %vm388_vm13 = vcmp.eq.f32.partialorder %v75_v35, 8.507059e+37 }
  0x82   :  { %v234_v21 = vpop.eup %233  ;;  %v78_v50 = vor.u32 1.1754944e-38, %v77_v38 }
  0x83   :  { %v236_v22 = vpop.eup %235  ;;  %v127_v23 = vmul.f32 %v234_v21, %v48_v16  ;;  %v359_v24 = vpop.xlane.xlu2 %50  ;;  %vm132_vm7 = vweird.f32 %v234_v21 }
  0x84   :  { %v97_v25 = vmul.f32 %v236_v22, %v353_v17  ;;  %239 = vrcp.f32 %v359_v24  ;;  %v365_v27 = vpop.xlane.xlu1 %44  ;;  %v238_v28 = vpop.eup %237  ;;  %vm102_vm9 = vweird.f32 %v236_v22  ;;  %v150_v44 = vand.u32 2147483647, %v359_v24  ;;  %vm133_vm11 = vmor %vm131_vm1, %vm132_vm7 }
  0x85   :  { %v128_v29 = vsub.f32 1.0, %v127_v23  ;;  %v67_v34 = vmul.f32 %v238_v28, %v355_v18  ;;  %v376_v36 = vpop.xlane.xlu0 %38  ;;  %241 = vrcp.f32 %v365_v27  ;;  %vm72_vm12 = vweird.f32 %v238_v28  ;;  %vm103_vm14 = vmor %vm101_vm3, %vm102_vm9 }
  0x86   :  { %v98_v33 = vsub.f32 1.0, %v97_v25  ;;  %243 = vrcp.f32 %v376_v36  ;;  %vm146_vm15 = vweird.f32 %v359_v24  ;;  %vm63_vm1 = vcmp.ne.f32.partialorder %v359_v24, 0.0  ;;  %vm73_vm3 = vmor %vm71_vm6, %vm72_vm12 }
  0x87   :  { %v129_v37 = vmul.f32 %v234_v21, %v128_v29  ;;  %v68_v41 = vsub.f32 1.0, %v67_v34  ;;  %v152_v55 = vand.u32 2147483648, %v359_v24  ;;  %vm406_vm7 = vcmp.eq.f32.partialorder %v150_v44, 8.507059e+37 }
  0x88   :  { %v99_v39 = vmul.f32 %v236_v22, %v98_v33  ;;  %v120_v19 = vand.u32 2147483647, %v365_v27  ;;  %v122_v20 = vand.u32 2147483648, %v365_v27  ;;  %vm116_vm6 = vweird.f32 %v365_v27 }
  0x89   :  { %v130_v42 = vadd.f32 %v234_v21, %v129_v37  ;;  %v69_v47 = vmul.f32 %v238_v28, %v68_v41  ;;  %v153_v14 = vor.u32 1.1754944e-38, %v152_v55  ;;  %v92_v25 = vand.u32 2147483648, %v376_v36 }
  0x8a   :  { %v240_v45 = vpop.eup %239  ;;  %v100_v46 = vadd.f32 %v236_v22, %v99_v39  ;;  %vm61_vm12 = vcmp.ne.f32.partialorder %v365_v27, 0.0 }
  0x8b   :  { %v134_v49 = vsel %vm133_vm11, %v234_v21, %v130_v42  ;;  %v142_v51 = vmul.f32 %v240_v45, %v359_v24  ;;  %v70_v54 = vadd.f32 %v238_v28, %v69_v47  ;;  %v242_v56 = vpop.eup %241  ;;  %vm86_vm11 = vweird.f32 %v376_v36 }
  0x8c   :  { %v139_v52 = vsel %vm367_vm4, %v138_v31, %v134_v49  ;;  %v104_v53 = vsel %vm103_vm14, %v236_v22, %v100_v46  ;;  %v112_v3 = vmul.f32 %v242_v56, %v365_v27  ;;  %v244_v4 = vpop.eup %243  ;;  %v417_v11 = vpop.xlane.xlu1 %56  ;;  %v123_v31 = vor.u32 1.1754944e-38, %v122_v20 }
  0x8d   :  { %v190_v57 = vsel %vm62_vm2, %v139_v52, 0.0  ;;  %v109_v58 = vsel %vm381_vm10, %v108_v43, %v104_v53  ;;  %v143_v59 = vsub.f32 1.0, %v142_v51  ;;  %v74_v63 = vsel %vm73_vm3, %v238_v28, %v70_v54  ;;  %v430_v22 = vpop.xlane.xlu0 %53 }
  0x8e   :  { %v198_v61 = vmul.f32 %v190_v57, %v321_v0  ;;  %v188_v62 = vsel %vm60_vm5, %v109_v58, 0.0  ;;  %v79_v9 = vsel %vm388_vm13, %v78_v50, %v74_v63  ;;  %vm147_vm2 = vweird.f32 %v240_v45 }
  0x8f   :  { %v196_v5 = vmul.f32 %v188_v62, %v323_v1  ;;  %v144_v10 = vmul.f32 %v240_v45, %v143_v59  ;;  %v186_v0 = vsel %vm58_vm8, %v79_v9, 0.0  ;;  %v113_v15 = vsub.f32 1.0, %v112_v3  ;;  %vm148_vm4 = vmor %vm146_vm15, %vm147_vm2 }
  0x90   :  { %206 = vst.msk [vmem:[#allocation5 + $0x20] sm:$0xff] %vm33_vm0, %v198_v61  ;;  %v82_v16 = vmul.f32 %v244_v4, %v376_v36  ;;  %v194_v1 = vmul.f32 %v186_v0, %v325_v2  ;;  %vm117_vm5 = vweird.f32 %v242_v56  ;;  %245 = vrcp.f32 %v417_v11 }
  0x91   :  { %204 = vst.msk [vmem:[#allocation5 + $0x10] sm:$0xff] %vm33_vm0, %v196_v5  ;;  %v145_v17 = vadd.f32 %v240_v45, %v144_v10  ;;  %v114_v21 = vmul.f32 %v242_v56, %v113_v15  ;;  %v90_v2 = vand.u32 2147483647, %v376_v36  ;;  %vm87_vm8 = vweird.f32 %v244_v4  ;;  %vm118_vm9 = vmor %vm116_vm6, %vm117_vm5 }
  0x92   :  { %v83_v18 = vsub.f32 1.0, %v82_v16  ;;  %202 = vst.msk [vmem:[#allocation5] sm:$0xff] %vm33_vm0, %v194_v1  ;;  %vm121_vm10 = vcmp.eq.f32.partialorder %v120_v19, 8.507059e+37  ;;  %247 = vrcp.f32 %v430_v22  ;;  %vm88_vm13 = vmor %vm86_vm11, %vm87_vm8  ;;  %v93_v37 = vor.u32 1.1754944e-38, %v92_v25 }
  0x93   :  { %v149_v23 = vsel %vm148_vm4, %v240_v45, %v145_v17  ;;  %v115_v28 = vadd.f32 %v242_v56, %v114_v21  ;;  %vm91_vm14 = vcmp.eq.f32.partialorder %v90_v2, 8.507059e+37  ;;  %vm59_vm15 = vcmp.ne.f32.partialorder %v376_v36, 0.0 }
  0x94   :  { %v154_v26 = vsel %vm406_vm7, %v153_v14, %v149_v23  ;;  %v84_v29 = vmul.f32 %v244_v4, %v83_v18  ;;  %v182_v45 = vand.u32 2147483648, %v417_v11  ;;  %vm176_vm3 = vweird.f32 %v417_v11 }
  0x95   :  { %v191_v30 = vsel %vm63_vm1, %v154_v26, 0.0  ;;  %v119_v33 = vsel %vm118_vm9, %v242_v56, %v115_v28  ;;  %v167_v49 = vand.u32 2147483648, %v430_v22  ;;  %v165_v51 = vand.u32 2147483647, %v430_v22 }
  0x96   :  { %v199_v32 = vmul.f32 %v191_v30, %v333_v6  ;;  %v85_v34 = vadd.f32 %v244_v4, %v84_v29  ;;  %v124_v35 = vsel %vm121_vm10, %v123_v31, %v119_v33  ;;  %v246_v38 = vpop.eup %245  ;;  %v183_v50 = vor.u32 1.1754944e-38, %v182_v45 }
  0x97   :  { %v189_v24 = vsel %vm61_vm12, %v124_v35, 0.0  ;;  %v172_v41 = vmul.f32 %v246_v38, %v417_v11  ;;  %vm177_vm1 = vweird.f32 %v246_v38  ;;  %vm65_vm5 = vcmp.ne.f32.partialorder %v417_v11, 0.0 }
  0x98   :  { %207 = vst.msk [vmem:[#allocation5 + $0x28] sm:$0xff] %vm33_vm0, %v199_v32  ;;  %v89_v39 = vsel %vm88_vm13, %v244_v4, %v85_v34  ;;  %v197_v40 = vmul.f32 %v189_v24, %v335_v7  ;;  %v248_v43 = vpop.eup %247  ;;  %v180_v7 = vand.u32 2147483647, %v417_v11  ;;  %vm178_vm7 = vmor %vm176_vm3, %vm177_vm1  ;;  %vm161_vm6 = vweird.f32 %v430_v22 }
  0x99   :  { %v94_v6 = vsel %vm91_vm14, %v93_v37, %v89_v39  ;;  %v173_v44 = vsub.f32 1.0, %v172_v41  ;;  %v157_v46 = vmul.f32 %v248_v43, %v430_v22  ;;  %vm162_vm2 = vweird.f32 %v248_v43 }
  0x9a   :  { %v187_v42 = vsel %vm59_vm15, %v94_v6, 0.0  ;;  %205 = vst.msk [vmem:[#allocation5 + $0x18] sm:$0xff] %vm33_vm0, %v197_v40  ;;  %vm181_vm4 = vcmp.eq.f32.partialorder %v180_v7, 8.507059e+37  ;;  %vm163_vm8 = vmor %vm161_vm6, %vm162_vm2  ;;  %v168_v56 = vor.u32 1.1754944e-38, %v167_v49  ;;  %vm166_vm9 = vcmp.eq.f32.partialorder %v165_v51, 8.507059e+37 }
  0x9b   :  { %v195_v27 = vmul.f32 %v187_v42, %v337_v8  ;;  %v174_v47 = vmul.f32 %v246_v38, %v173_v44  ;;  %v158_v36 = vsub.f32 1.0, %v157_v46  ;;  %vm64_vm10 = vcmp.ne.f32.partialorder %v430_v22, 0.0 }
  0x9d   :  { %203 = vst.msk [vmem:[#allocation5 + $0x8] sm:$0xff] %vm33_vm0, %v195_v27  ;;  %v175_v48 = vadd.f32 %v246_v38, %v174_v47  ;;  %v159_v8 = vmul.f32 %v248_v43, %v158_v36 }
  0x9f   :  { %v179_v52 = vsel %vm178_vm7, %v246_v38, %v175_v48  ;;  %v160_v54 = vadd.f32 %v248_v43, %v159_v8 }
  0xa0   :  { %v184_v53 = vsel %vm181_vm4, %v183_v50, %v179_v52 }
  0xa1   :  { %v193_v55 = vsel %vm65_vm5, %v184_v53, 0.0  ;;  %v164_v58 = vsel %vm163_vm8, %v248_v43, %v160_v54 }
  0xa2   :  { %v201_v57 = vmul.f32 %v193_v55, %v345_v12  ;;  %v169_v59 = vsel %vm166_vm9, %v168_v56, %v164_v58 }
  0xa3   :  { %v192_v60 = vsel %vm64_vm10, %v169_v59, 0.0 }
  0xa4   :  { %209 = vst.msk [vmem:[#allocation5 + $0x38] sm:$0xff] %vm33_vm0, %v201_v57  ;;  %v200_v61 = vmul.f32 %v192_v60, %v347_v13 }
  0xa6   :  { %208 = vst.msk [vmem:[#allocation5 + $0x30] sm:$0xff] %vm33_vm0, %v200_v61 }
  0xa7   :  { %222 = dma.vmem_to_hbm [thread:$0]  %s215_s13, 1024, %s217_s16, [#allocation4], %s302_s11, %s302_s11, %s303_s12  }
  0xa8   :  { %299 = dma.done.wait [#allocation4], 1024  }
  0xa9   :  { %300 = vsyncadd [#allocation4], 4294966272 }
  0xaa   :  { %227 = vsyncpa [#allocation3], 1 }
  0xab   :  { %228 = vsyncpa [#allocation4], 1 }

</bundles_post_ra>
